<compile_context>
chip_gen: v7x
topology: tpu7x:2x2x1
jax: 0.10.0
libtpu: 0.0.40
codegen_flags: <defaults>
</compile_context>

<pallas_src>
import functools
import math

import jax
import jax.numpy as jnp
from jax.experimental import pallas as pl
from jax.experimental.pallas import tpu as pltpu


_TABLE_ROWS = 128  # stacked table rows, padded to one full lane tile
_HOUR, _WEEKDAY, _DAY, _MONTH, _MINUTE = 24, 7, 32, 13, 4


def _round_up(a, m):
    return ((a + m - 1) // m) * m


def _pe_rows(c_in, d_model):
    """FixedEmbedding weight: the (c_in, d_model) sinusoidal table, float32."""
    position = jnp.arange(c_in, dtype=jnp.float32)[:, None]
    div_term = jnp.exp(
        jnp.arange(0, d_model, 2, dtype=jnp.float32)
        * (-math.log(10000.0) / d_model))
    w = jnp.zeros((c_in, d_model), jnp.float32)
    w = w.at[:, 0::2].set(jnp.sin(position * div_term))
    w = w.at[:, 1::2].set(jnp.cos(position * div_term))
    return w


@functools.lru_cache(maxsize=None)
def _stacked_tables(d_model, with_minute):
    """Stacked [hour|weekday|day|month|(minute)] table, exact bf16 hi/lo split."""
    sizes = (_HOUR, _WEEKDAY, _DAY, _MONTH) + ((_MINUTE,) if with_minute else ())
    offsets, acc = [], 0
    for c in sizes:
        offsets.append(acc)
        acc += c
    parts = [_pe_rows(c, d_model) for c in sizes]
    parts.append(jnp.zeros((_TABLE_ROWS - acc, d_model), jnp.float32))
    table = jnp.concatenate(parts, axis=0)                 # (128, d_model) f32
    hi = table.astype(jnp.bfloat16)                        # exact bf16 head
    lo = (table - hi.astype(jnp.float32)).astype(jnp.bfloat16)  # residual, |err| <= 2^-18
    return hi, lo, tuple(offsets)


def _temporal_kernel(idx_ref, tab_hi_ref, tab_lo_ref, o_ref):
    """One (tile, d_model) output tile: multi_hot(idx) @ table on the MXU."""
    idx = idx_ref[...]                        # (tile, F) int32, already table-offset
    tile, n_feats = idx.shape
    rows = tab_hi_ref.shape[0]                # 128
    r = jax.lax.broadcasted_iota(jnp.int32, (tile, rows), 1)

    onehot = jnp.zeros((tile, rows), jnp.float32)
    for f in range(n_feats):                  # static unroll, F in {4, 5}
        onehot = onehot + (idx[:, f:f + 1] == r).astype(jnp.float32)
    onehot = onehot.astype(jnp.bfloat16)      # small ints -> exact in bf16

    acc = jnp.dot(onehot, tab_hi_ref[...], preferred_element_type=jnp.float32)
    acc = acc + jnp.dot(onehot, tab_lo_ref[...], preferred_element_type=jnp.float32)
    o_ref[...] = acc


def temporal_embedding(x, d_model, freq="h"):
    """Forward pass of TemporalEmbedding(d_model, embed_type='fixed', freq)."""
    assert d_model % 2 == 0, "d_model must be even (mirrors the PyTorch module)"
    with_minute = (freq == "t")
    B, L, C = x.shape
    # forward() column order: hour, weekday, day, month, (minute)
    feat_cols = (3, 2, 1, 0) + ((4,) if with_minute else ())
    assert C > max(feat_cols), "x has too few time-feature columns for this freq"

    tab_hi, tab_lo, offsets = _stacked_tables(d_model, with_minute)

    x = x.astype(jnp.int32)                               # x.long()
    idx = jnp.stack([x[:, :, c] for c in feat_cols], axis=-1)   # (B, L, F)
    n_tokens = B * L
    n_feats = len(feat_cols)
    idx = idx.reshape(n_tokens, n_feats) + jnp.asarray(offsets, jnp.int32)[None, :]

    # Fixed, VMEM-budgeted token tile + cdiv grid. Pallas double-buffers the
    # output block, so keep 2 * tile * d_model * 4 B within ~8 MiB (safe on
    # v7x's smaller VMEM too); realistic token counts then give >= 2 grid steps
    # so both v7x TensorCores get work.
    tile_cap = max(8, ((8 << 20) // (2 * 4 * d_model)) // 8 * 8)
    tile = min(512, _round_up(n_tokens, 8), tile_cap)
    n_pad = _round_up(n_tokens, tile)
    if n_pad != n_tokens:
        # Padded rows point at a guaranteed zero row of the table -> output 0,
        # sliced off below.
        idx = jnp.pad(idx, ((0, n_pad - n_tokens), (0, 0)),
                      constant_values=_TABLE_ROWS - 1)
    grid = (n_pad // tile,)

    out = pl.pallas_call(
        _temporal_kernel,
        out_shape=jax.ShapeDtypeStruct((n_pad, d_model), jnp.float32),
        grid=grid,
        in_specs=[
            pl.BlockSpec((tile, n_feats), lambda i: (i, 0)),
            pl.BlockSpec((_TABLE_ROWS, d_model), lambda i: (0, 0)),  # resident table (hi)
            pl.BlockSpec((_TABLE_ROWS, d_model), lambda i: (0, 0)),  # resident table (lo)
        ],
        out_specs=pl.BlockSpec((tile, d_model), lambda i: (i, 0)),
        compiler_params=pltpu.CompilerParams(
            dimension_semantics=("parallel",)),
    )(idx, tab_hi, tab_lo)

    return out[:n_tokens].reshape(B, L, d_model)


def _reference_temporal(x, d_model, freq="h"):
    """Pure-JAX mirror of the PyTorch TemporalEmbedding forward."""
    x = x.astype(jnp.int32)
    out = (_pe_rows(_HOUR, d_model)[x[:, :, 3]]
           + _pe_rows(_WEEKDAY, d_model)[x[:, :, 2]]
           + _pe_rows(_DAY, d_model)[x[:, :, 1]]
           + _pe_rows(_MONTH, d_model)[x[:, :, 0]])
    if freq == "t":
        out = out + _pe_rows(_MINUTE, d_model)[x[:, :, 4]]
    return out


if __name__ == "__main__":
    key = jax.random.PRNGKey(0)
    B, L, d_model = 2, 8, 32
    k_mo, k_d, k_wd, k_h, k_mi = jax.random.split(key, 5)
    month = jax.random.randint(k_mo, (B, L), 0, _MONTH)
    day = jax.random.randint(k_d, (B, L), 0, _DAY)
    weekday = jax.random.randint(k_wd, (B, L), 0, _WEEKDAY)
    hour = jax.random.randint(k_h, (B, L), 0, _HOUR)
    minute = jax.random.randint(k_mi, (B, L), 0, _MINUTE)
    # x[:,:,0]=month, 1=day, 2=weekday, 3=hour, 4=minute  (module's layout)
    x = jnp.stack([month, day, weekday, hour, minute], axis=-1).astype(jnp.int32)

    for freq in ("h", "t"):
        out = jax.block_until_ready(temporal_embedding(x, d_model, freq=freq))
        ref = _reference_temporal(x, d_model, freq=freq)
        assert out.shape == (B, L, d_model), out.shape
        err = float(jnp.max(jnp.abs(out - ref)))
        assert err < 1e-4, f"freq={freq}: max abs err {err}"

    print("KERNEL_OK")
</pallas_src>

<mosaic_0001>
module attributes {stable_mosaic.version = 11 : i64} {
  func.func @_temporal_kernel(%arg0: i32, %arg1: memref<16x4xi32, #tpu.memory_space<vmem>>, %arg2: memref<128x32xbf16, #tpu.memory_space<vmem>>, %arg3: memref<128x32xbf16, #tpu.memory_space<vmem>>, %arg4: memref<16x32xf32, #tpu.memory_space<vmem>>) attributes {dimension_semantics = [#tpu.dimension_semantics<parallel>], iteration_bounds = array<i64: 1>, scalar_prefetch = 0 : i64, scratch_operands = 0 : i64, tpu.core_type = #tpu.core_type<tc>, window_params = [{transform_indices = @transform_0, window_bounds = array<i64: 16, 4>}, {pipeline_mode = #tpu.pipeline_mode<synchronous>, transform_indices = @transform_1, window_bounds = array<i64: 128, 32>}, {pipeline_mode = #tpu.pipeline_mode<synchronous>, transform_indices = @transform_2, window_bounds = array<i64: 128, 32>}, {transform_indices = @transform_3, window_bounds = array<i64: 16, 32>}]} {
    %c0 = arith.constant 0 : index
    %c0_0 = arith.constant 0 : index
    %0 = vector.load %arg1[%c0, %c0_0] : memref<16x4xi32, #tpu.memory_space<vmem>>, vector<16x4xi32>
    %1 = tpu.iota {dimensions = array<i32: 1>} : vector<16x128xi32>
    %cst = arith.constant 0.000000e+00 : f32
    %2 = vector.broadcast %cst : f32 to vector<16x128xf32>
    %3 = vector.extract_strided_slice %0 {offsets = [0, 0], sizes = [16, 1], strides = [1, 1]} : vector<16x4xi32> to vector<16x1xi32>
    %4 = vector.broadcast %3 : vector<16x1xi32> to vector<16x128xi32>
    %5 = arith.cmpi eq, %4, %1 : vector<16x128xi32>
    %6 = arith.extui %5 : vector<16x128xi1> to vector<16x128xi32>
    %7 = arith.sitofp %6 : vector<16x128xi32> to vector<16x128xf32>
    %8 = arith.addf %2, %7 : vector<16x128xf32>
    %9 = vector.extract_strided_slice %0 {offsets = [0, 1], sizes = [16, 1], strides = [1, 1]} : vector<16x4xi32> to vector<16x1xi32>
    %10 = vector.broadcast %9 : vector<16x1xi32> to vector<16x128xi32>
    %11 = arith.cmpi eq, %10, %1 : vector<16x128xi32>
    %12 = arith.extui %11 : vector<16x128xi1> to vector<16x128xi32>
    %13 = arith.sitofp %12 : vector<16x128xi32> to vector<16x128xf32>
    %14 = arith.addf %8, %13 : vector<16x128xf32>
    %15 = vector.extract_strided_slice %0 {offsets = [0, 2], sizes = [16, 1], strides = [1, 1]} : vector<16x4xi32> to vector<16x1xi32>
    %16 = vector.broadcast %15 : vector<16x1xi32> to vector<16x128xi32>
    %17 = arith.cmpi eq, %16, %1 : vector<16x128xi32>
    %18 = arith.extui %17 : vector<16x128xi1> to vector<16x128xi32>
    %19 = arith.sitofp %18 : vector<16x128xi32> to vector<16x128xf32>
    %20 = arith.addf %14, %19 : vector<16x128xf32>
    %21 = vector.extract_strided_slice %0 {offsets = [0, 3], sizes = [16, 1], strides = [1, 1]} : vector<16x4xi32> to vector<16x1xi32>
    %22 = vector.broadcast %21 : vector<16x1xi32> to vector<16x128xi32>
    %23 = arith.cmpi eq, %22, %1 : vector<16x128xi32>
    %24 = arith.extui %23 : vector<16x128xi1> to vector<16x128xi32>
    %25 = arith.sitofp %24 : vector<16x128xi32> to vector<16x128xf32>
    %26 = arith.addf %20, %25 : vector<16x128xf32>
    %27 = arith.truncf %26 : vector<16x128xf32> to vector<16x128xbf16>
    %c0_1 = arith.constant 0 : index
    %c0_2 = arith.constant 0 : index
    %28 = vector.load %arg2[%c0_1, %c0_2] : memref<128x32xbf16, #tpu.memory_space<vmem>>, vector<128x32xbf16>
    %cst_3 = arith.constant dense<0.000000e+00> : vector<16x32xf32>
    %29 = tpu.matmul %27, %28, %cst_3 {dimension_numbers = #tpu.dot_dimension_numbers<[1], [0], [0], [1], [0, 0, 1, 1], [], []>} : vector<16x128xbf16>, vector<128x32xbf16>, vector<16x32xf32> -> vector<16x32xf32>
    %c0_4 = arith.constant 0 : index
    %c0_5 = arith.constant 0 : index
    %30 = vector.load %arg3[%c0_4, %c0_5] : memref<128x32xbf16, #tpu.memory_space<vmem>>, vector<128x32xbf16>
    %cst_6 = arith.constant dense<0.000000e+00> : vector<16x32xf32>
    %31 = tpu.matmul %27, %30, %cst_6 {dimension_numbers = #tpu.dot_dimension_numbers<[1], [0], [0], [1], [0, 0, 1, 1], [], []>} : vector<16x128xbf16>, vector<128x32xbf16>, vector<16x32xf32> -> vector<16x32xf32>
    %32 = arith.addf %29, %31 : vector<16x32xf32>
    %c0_7 = arith.constant 0 : index
    %c0_8 = arith.constant 0 : index
    %33 = vector.load %arg4[%c0_7, %c0_8] : memref<16x32xf32, #tpu.memory_space<vmem>>, vector<16x32xf32>
    tpu.vector_store %arg4[%c0_7, %c0_8], %32 {strides = array<i32>} : memref<16x32xf32, #tpu.memory_space<vmem>>, vector<16x32xf32>,
    return
  }
  func.func @transform_0(%arg0: i32) -> (i32, i32) {
    %c0_i32 = arith.constant 0 : i32
    %c0_i32_0 = arith.constant 0 : i32
    return %arg0, %c0_i32 : i32, i32
  }
  func.func @transform_1(%arg0: i32) -> (i32, i32) {
    %c0_i32 = arith.constant 0 : i32
    %c0_i32_0 = arith.constant 0 : i32
    %c0_i32_1 = arith.constant 0 : i32
    return %c0_i32, %c0_i32_0 : i32, i32
  }
  func.func @transform_2(%arg0: i32) -> (i32, i32) {
    %c0_i32 = arith.constant 0 : i32
    %c0_i32_0 = arith.constant 0 : i32
    %c0_i32_1 = arith.constant 0 : i32
    return %c0_i32, %c0_i32_0 : i32, i32
  }
  func.func @transform_3(%arg0: i32) -> (i32, i32) {
    %c0_i32 = arith.constant 0 : i32
    %c0_i32_0 = arith.constant 0 : i32
    return %arg0, %c0_i32 : i32, i32
  }
}

</mosaic_0001>

<bundles_post_ra>
// kernel: tpu_custom_call.1
= control target key start
LH: loop header
LB: loop body
LE: loop exit
PB: predicated region body
PF: predicated region fallthrough
CT: control target
= control target key end

     0   :  { %v445_v1 = vmov 1   ;;  %v446_v2 = vmov 0   ;;  %v447_v6 = vmov 0.0   ;;  %v448_v11 = vmov 2   ;;  %s566_s0 = inlined_call_operand.vmem [shape: s32[16,4], index: 0, kind: input, shape index: {}]   ;;  %s567_s1 = inlined_call_operand.vmem [shape: bf16[128,32], index: 1, kind: input, shape index: {}]   ;;  %s568_s2 = inlined_call_operand.vmem [shape: bf16[128,32], index: 2, kind: input, shape index: {}]   ;;  %s569_s3 = inlined_call_operand.hbm [shape: f32[16,32], index: 3, kind: output, shape index: {}]  }
   0x1   :  { %v16_v0 = vld [vmem:[%s566_s0] sm:$0xff]  ;;  %400 = vset.pattern.permute.xlu1 %v445_v1  ;;  %399 = vset.pattern.permute.xlu0 %v446_v2  ;;  %v17_v3 = vld [vmem:[%s566_s0 + $0x8] sm:$0xff]  ;;  %v409_v9 = vld [vmem:[%s568_s2 + $0x10] sm:$0xff]   ;;  %v449_v14 = vmov 3  }
   0x2   :  { %v405_v4 = vld [vmem:[%s568_s2] sm:$0xff]   ;;  %35 = vperm.xlu1 %400, %v16_v0   ;;  %21 = vperm.xlu0 %399, %v16_v0   ;;  %v407_v7 = vld [vmem:[%s568_s2 + $0x8] sm:$0xff]   ;;  %v410_v10 = vld [vmem:[%s567_s1 + $0x10] sm:$0xff]  }
   0x3   :  { %v406_v5 = vld [vmem:[%s567_s1] sm:$0xff]   ;;  %348 = vmatprep.subr.bf16.mxu1 %v447_v6  ;;  %368 = vmatprep.subr.bf16.mxu0 %v447_v6  ;;  %v408_v8 = vld [vmem:[%s567_s1 + $0x8] sm:$0xff]   ;;  %v411_v12 = vld [vmem:[%s568_s2 + $0x18] sm:$0xff]  }
   0x4   :  { %349 = vmatpush3.bf16.msra.mxu1 %v405_v4  ;;  %369 = vmatpush3.bf16.msra.mxu0 %v406_v5  ;;  %v412_v13 = vld [vmem:[%s567_s1 + $0x18] sm:$0xff]  }
   0x5   :  { %350 = vmatprep.subr.bf16.mxu1 %v447_v6  ;;  %370 = vmatprep.subr.bf16.mxu0 %v447_v6 }
   0x6   :  { %38 = vperm.xlu1 %400, %v17_v3   ;;  %24 = vperm.xlu0 %399, %v17_v3  }
   0x8   :  { %351 = vmatpush3.bf16.msra.mxu1 %v407_v7  ;;  %371 = vmatpush3.bf16.msra.mxu0 %v408_v8 }
   0x9   :  { %352 = vmatprep.subr.bf16.mxu1 %v447_v6  ;;  %372 = vmatprep.subr.bf16.mxu0 %v447_v6 }
   0xa   :  { %402 = vset.pattern.permute.xlu1 %v448_v11  ;;  %401 = vset.pattern.permute.xlu0 %v448_v11 }
   0xb   :  { %52 = vperm.xlu1 %402, %v17_v3   ;;  %49 = vperm.xlu0 %401, %v16_v0  }
   0xc   :  { %353 = vmatpush3.bf16.msra.mxu1 %v409_v9  ;;  %373 = vmatpush3.bf16.msra.mxu0 %v410_v10 }
   0xd   :  { %354 = vmatprep.subr.bf16.mxu1 %v447_v6  ;;  %374 = vmatprep.subr.bf16.mxu0 %v447_v6 }
   0xf   :  { %403 = vset.pattern.permute.xlu1 %v449_v14  ;;  %404 = vset.pattern.permute.xlu0 %v449_v14 }
  0x10   :  { %63 = vperm.xlu1 %403, %v16_v0   ;;  %66 = vperm.xlu0 %404, %v17_v3  }
  0x11   :  { %8 = vsyncpa [#allocation3], 0  ;;  %355 = vmatpush3.bf16.msra.mxu1 %v411_v12  ;;  %375 = vmatpush3.bf16.msra.mxu0 %v412_v13  ;;  %v413_v15 = vld [vmem:[%s568_s2 + $0x20] sm:$0xff]   ;;  %vm450_vm0 = vmmov 0   ;;  %v415_v17 = vld [vmem:[%s568_s2 + $0x28] sm:$0xff]   ;;  %v18_v23 = vlaneseq  ;;  %vm287_vm9 = vcmask 261120  }
  0x12   :  { %v414_v16 = vld [vmem:[%s567_s1 + $0x20] sm:$0xff]   ;;  %356 = vmatprep.subr.bf16.mxu1 %v447_v6  ;;  %376 = vmatprep.subr.bf16.mxu0 %v447_v6  ;;  %v416_v18 = vld [vmem:[%s567_s1 + $0x28] sm:$0xff]   ;;  %v417_v19 = vld [vmem:[%s568_s2 + $0x30] sm:$0xff]  }
  0x13   :  { %364 = vmatprep.mubr.msk.bf16.mxu1 %vm450_vm0, %v447_v6  ;;  %384 = vmatprep.mubr.msk.bf16.mxu0 %vm450_vm0, %v447_v6  ;;  %v418_v20 = vld [vmem:[%s567_s1 + $0x30] sm:$0xff]   ;;  %v419_v21 = vld [vmem:[%s568_s2 + $0x38] sm:$0xff]   ;;  %v19_v26 = vand.u32 127, %v18_v23 }
  0x14   :  { %v420_v22 = vld [vmem:[%s567_s1 + $0x38] sm:$0xff]   ;;  %s451_s1 = smov [#allocation2]  }
  0x15   :  { %357 = vmatpush3.bf16.msra.mxu1 %v413_v15  ;;  %377 = vmatpush3.bf16.msra.mxu0 %v414_v16  ;;  %s295_s2 = sshll.u32 %s451_s1, 4  ;;  %s296_s2 = int_to_ptr.vmem [resolvable:$true] %s295_s2 }
  0x16   :  { %358 = vmatprep.subr.bf16.mxu1 %v447_v6  ;;  %378 = vmatprep.subr.bf16.mxu0 %v447_v6  ;;  %s421_s20 = scalar_lea.vmem %s296_s2, 256  ;;  %p426_p1 = scmp.lt.s32.totalorder %s296_s2, %s296_s2 }
  0x17   :  { %p422_p0 = scmp.ne.s32.totalorder %s296_s2, %s421_s20  ;;  %p427_p2 = scmp.lt.s32.totalorder %s421_s20, %s421_s20 }
  0x19   :  { %359 = vmatpush3.bf16.msra.mxu1 %v415_v17  ;;  %379 = vmatpush3.bf16.msra.mxu0 %v416_v18  ;;  %p428_p3 = por %p427_p2, %p426_p1 }
  0x1a   :  { %360 = vmatprep.subr.bf16.mxu1 %v447_v6  ;;  %380 = vmatprep.subr.bf16.mxu0 %v447_v6 }
  0x1b   :  { %p429_p4 = pnand %p428_p3, %p422_p0 }
  0x1d   :  { %361 = vmatpush3.bf16.msra.mxu1 %v417_v19  ;;  %381 = vmatpush3.bf16.msra.mxu0 %v418_v20 }
  0x1e   :  { %362 = vmatprep.subr.bf16.mxu1 %v447_v6  ;;  %382 = vmatprep.subr.bf16.mxu0 %v447_v6 }
  0x21   :  { %363 = vmatpush3.bf16.msra.mxu1 %v419_v21  ;;  %383 = vmatpush3.bf16.msra.mxu0 %v420_v22 }
  0x81   :  { %v36_v24 = vpop.permute.xlu1 %35  ;;  %v22_v25 = vpop.permute.xlu0 %21 }
  0x82   :  { %vm40_vm1 = vcmp.eq.s32.totalorder %v36_v24, %v19_v26  ;;  %vm26_vm2 = vcmp.eq.s32.totalorder %v22_v25, %v19_v26 }
  0x83   :  { %v308_v29 = vsel %vm40_vm1, 1.0, %v447_v6  ;;  %v306_v30 = vsel %vm26_vm2, 1.0, %v447_v6 }
  0x84   :  { %v46_v37 = vadd.f32 %v308_v29, %v306_v30 }
  0x85   :  { %v39_v27 = vpop.permute.xlu1 %38  ;;  %v25_v28 = vpop.permute.xlu0 %24 }
  0x86   :  { %vm41_vm3 = vcmp.eq.s32.totalorder %v39_v27, %v19_v26  ;;  %vm27_vm4 = vcmp.eq.s32.totalorder %v25_v28, %v19_v26 }
  0x87   :  { %v309_v33 = vsel %vm41_vm3, 1.0, %v447_v6  ;;  %v307_v34 = vsel %vm27_vm4, 1.0, %v447_v6 }
  0x88   :  { %v47_v38 = vadd.f32 %v309_v33, %v307_v34 }
  0x8a   :  { %v53_v31 = vpop.permute.xlu1 %52  ;;  %v50_v32 = vpop.permute.xlu0 %49 }
  0x8b   :  { %vm55_vm5 = vcmp.eq.s32.totalorder %v53_v31, %v19_v26  ;;  %vm54_vm6 = vcmp.eq.s32.totalorder %v50_v32, %v19_v26 }
  0x8c   :  { %v311_v35 = vsel %vm55_vm5, 1.0, %v447_v6  ;;  %v310_v36 = vsel %vm54_vm6, 1.0, %v447_v6 }
  0x8d   :  { %v61_v41 = vadd.f32 %v311_v35, %v47_v38  ;;  %v60_v42 = vadd.f32 %v310_v36, %v46_v37 }
  0x8f   :  { %v64_v39 = vpop.permute.xlu1 %63  ;;  %v67_v40 = vpop.permute.xlu0 %66 }
  0x90   :  { %vm68_vm7 = vcmp.eq.s32.totalorder %v64_v39, %v19_v26  ;;  %vm69_vm8 = vcmp.eq.s32.totalorder %v67_v40, %v19_v26 }
  0x91   :  { %v312_v43 = vsel %vm68_vm7, 1.0, %v447_v6  ;;  %v313_v44 = vsel %vm69_vm8, 1.0, %v447_v6 }
  0x92   :  { %v74_v45 = vadd.f32 %v312_v43, %v60_v42  ;;  %v75_v46 = vadd.f32 %v313_v44, %v61_v41 }
  0x94   :  { %v76_v47 = vpack.c.bf16 %v75_v46, %v74_v45 }
  0x96   :  { %365 = vmatmul.mubr.bf16.vlgmr.msra.gmra.mrb[0].mxu1 %v76_v47  ;;  %385 = vmatmul.mubr.bf16.vlgmr.msra.gmra.mrb[0].mxu0 %v76_v47 }
 0x169   :  { %v191_v48 = vpop.f32.mrb[0].mxu1  ;;  %v280_v49 = vpop.f32.mrb[0].mxu0 }
 0x16a   :  { %v281_v50 = vadd.f32 %v280_v49, %v191_v48  ;;  %v366_v51 = vpop.f32.mrb[1].mxu1  ;;  %v386_v52 = vpop.f32.mrb[1].mxu0 }
 0x16b   :  { %v194_v53 = vpop.f32.mrb[2].mxu1  ;;  %v283_v54 = vpop.f32.mrb[2].mxu0 }
 0x16c   :  { %288 = vst.msk [vmem:[#allocation2] sm:$0xff] %vm287_vm9, %v281_v50  ;;  %v284_v55 = vadd.f32 %v283_v54, %v194_v53  ;;  %v367_v56 = vpop.f32.mrb[3].mxu1  ;;  %v387_v57 = vpop.f32.mrb[3].mxu0 }
 0x16e   :  { %289 = vst.msk [vmem:[#allocation2 + $0x8] sm:$0xff] %vm287_vm9, %v284_v55 }
 0x16f   :  { %432 = shalt.err (!%p429_p4)
}
 0x170   :  { %s433_s22 = scalar_lea.hbm %s569_s3, 256 }
 0x171   :  { %p434_p5 = scmp.ne.s32.totalorder %s569_s3, %s433_s22  ;;  %p437_p6 = scmp.lt.u32.totalorder %s433_s22, %s569_s3 }
 0x173   :  { %p439_p7 = pnand %p437_p6, %p434_p5 }
 0x175   :  { %442 = shalt.err (!%p439_p7)
}
 0x176   :  { %s452_s27 = smov 128   ;;  %s453_s28 = smov 8  }
 0x177   :  { %301 = dma.vmem_to_hbm [thread:$0]  %s296_s2, 256, %s569_s3, [#allocation3], %s452_s27, %s452_s27, %s453_s28  }
 0x178   :  { %443 = dma.done.wait [#allocation3], 256  }
 0x179   :  { %444 = vsyncadd [#allocation3], 4294967040 }
 0x17a   :  { %305 = vsyncpa [#allocation3], 1 }

</bundles_post_ra>
